<compile_context>
chip_gen: v5e
topology: v5e:2x2
jax: 0.10.0
libtpu: 0.0.40
codegen_flags: <defaults>
</compile_context>

<pallas_src>
import jax
import jax.numpy as jnp
from jax.experimental import pallas as pl
from jax.experimental.pallas import tpu as pltpu

LANES = 128          # lane width of a vreg (last dim must stay a multiple of this)
TILE_R_MAX = 2048    # rows per tile of the (rows, 128) slab -> 1 MiB f32 per buffer
SMALL_N = 1 << 17    # below ~1e5 elements the plain-jnp path wins (launch overhead)


def linreg_kernel(w_ref, b_ref, x_ref, o_ref):
    # w_ref, b_ref: SMEM scalars (shape (1,)); x_ref/o_ref: VMEM tiles (tile_r, 128)
    w = w_ref[0]
    b = b_ref[0]
    o_ref[...] = x_ref[...] * w + b


def _round_up(a, m):
    return ((a + m - 1) // m) * m


def linear_regression_forward(x, w, b, *, force_pallas=False):
    """x: (N, 1) f32, w: (1, 1) f32, b: (1,) f32 -> (N, 1) f32."""
    n = x.shape[0]
    x32 = jnp.asarray(x, jnp.float32)
    w_smem = jnp.asarray(w, jnp.float32).reshape(1)
    b_smem = jnp.asarray(b, jnp.float32).reshape(1)

    total = x32.size  # == n for in_features == 1

    # Tiny-batch fast path: kernel launch + grid-step overhead dwarfs the work.
    if not force_pallas and total < SMALL_N:
        return x32 * w_smem[0] + b_smem[0]

    # Lane-dense reshape: (N, 1) -> padded (rows_padded, 128) slab.
    rows = pl.cdiv(total, LANES)
    rows_aligned = _round_up(rows, 8)               # sublane multiple
    tile_r = min(TILE_R_MAX, rows_aligned)          # multiple of 8 by construction
    rows_padded = _round_up(rows_aligned, tile_r)
    padded_total = rows_padded * LANES

    x_flat = x32.reshape(total)
    x_flat = jnp.pad(x_flat, (0, padded_total - total))
    x_slab = x_flat.reshape(rows_padded, LANES)

    grid = (rows_padded // tile_r,)

    y_slab = pl.pallas_call(
        linreg_kernel,
        out_shape=jax.ShapeDtypeStruct((rows_padded, LANES), jnp.float32),
        grid=grid,
        in_specs=[
            pl.BlockSpec(memory_space=pltpu.SMEM),          # weight scalar
            pl.BlockSpec(memory_space=pltpu.SMEM),          # bias scalar
            pl.BlockSpec((tile_r, LANES), lambda i: (i, 0)),  # x row tile (VMEM)
        ],
        out_specs=pl.BlockSpec((tile_r, LANES), lambda i: (i, 0)),
        compiler_params=pltpu.CompilerParams(
            dimension_semantics=("parallel",),  # shard row tiles across TCs (v7x)
        ),
    )(w_smem, b_smem, x_slab)

    # Slice padded garbage away and restore the (N, 1) column layout.
    return y_slab.reshape(padded_total)[:total].reshape(n, 1)


if __name__ == "__main__":
    key = jax.random.PRNGKey(0)
    kx, kw, kb, kx2 = jax.random.split(key, 4)

    # Parameters matching nn.Linear(1, 1): weight (1, 1), bias (1,).
    w = jax.random.uniform(kw, (1, 1), jnp.float32, minval=-1.0, maxval=1.0)
    b = jax.random.uniform(kb, (1,), jnp.float32, minval=-1.0, maxval=1.0)

    # Small batch like the regression training data, shape (N, 1).
    x = jax.random.normal(kx, (8, 1), jnp.float32)
    y = jax.block_until_ready(
        linear_regression_forward(x, w, b, force_pallas=True)
    )
    y_ref = x @ w.T + b
    assert y.shape == (8, 1)
    assert jnp.allclose(y, y_ref, atol=1e-6, rtol=1e-6)

    # A non-multiple-of-128 batch to exercise the pad/tile/slice path.
    x2 = jax.random.normal(kx2, (300, 1), jnp.float32)
    y2 = jax.block_until_ready(
        linear_regression_forward(x2, w, b, force_pallas=True)
    )
    y2_ref = x2 @ w.T + b
    assert y2.shape == (300, 1)
    assert jnp.allclose(y2, y2_ref, atol=1e-6, rtol=1e-6)

    # Fast-path (plain jnp) dispatch for tiny batches also matches.
    y_small = jax.block_until_ready(linear_regression_forward(x, w, b))
    assert jnp.allclose(y_small, y_ref, atol=1e-6, rtol=1e-6)

    print("KERNEL_OK")
</pallas_src>

<mosaic_0001>
module attributes {stable_mosaic.version = 11 : i64} {
  func.func @linreg_kernel(%arg0: i32, %arg1: memref<1xf32, #tpu.memory_space<smem>>, %arg2: memref<1xf32, #tpu.memory_space<smem>>, %arg3: memref<8x128xf32, #tpu.memory_space<vmem>>, %arg4: memref<8x128xf32, #tpu.memory_space<vmem>>) attributes {dimension_semantics = [#tpu.dimension_semantics<parallel>], iteration_bounds = array<i64: 1>, scalar_prefetch = 0 : i64, scratch_operands = 0 : i64, tpu.core_type = #tpu.core_type<tc>, window_params = [{transform_indices = @transform_0, window_bounds = array<i64: 1>}, {transform_indices = @transform_1, window_bounds = array<i64: 1>}, {transform_indices = @transform_2, window_bounds = array<i64: 8, 128>}, {transform_indices = @transform_3, window_bounds = array<i64: 8, 128>}]} {
    %c0 = arith.constant 0 : index
    %0 = memref.load %arg1[%c0] : memref<1xf32, #tpu.memory_space<smem>>
    %c0_0 = arith.constant 0 : index
    %1 = memref.load %arg2[%c0_0] : memref<1xf32, #tpu.memory_space<smem>>
    %c0_1 = arith.constant 0 : index
    %c0_2 = arith.constant 0 : index
    %2 = vector.load %arg3[%c0_1, %c0_2] : memref<8x128xf32, #tpu.memory_space<vmem>>, vector<8x128xf32>
    %3 = vector.broadcast %0 : f32 to vector<8x128xf32>
    %4 = arith.mulf %2, %3 : vector<8x128xf32>
    %5 = vector.broadcast %1 : f32 to vector<8x128xf32>
    %6 = arith.addf %4, %5 : vector<8x128xf32>
    %c0_3 = arith.constant 0 : index
    %c0_4 = arith.constant 0 : index
    %7 = vector.load %arg4[%c0_3, %c0_4] : memref<8x128xf32, #tpu.memory_space<vmem>>, vector<8x128xf32>
    tpu.vector_store %arg4[%c0_3, %c0_4], %6 {strides = array<i32>} : memref<8x128xf32, #tpu.memory_space<vmem>>, vector<8x128xf32>,
    return
  }
  func.func @transform_0(%arg0: i32) -> i32 {
    %c0_i32 = arith.constant 0 : i32
    %c0_i32_0 = arith.constant 0 : i32
    return %c0_i32 : i32
  }
  func.func @transform_1(%arg0: i32) -> i32 {
    %c0_i32 = arith.constant 0 : i32
    %c0_i32_0 = arith.constant 0 : i32
    return %c0_i32 : i32
  }
  func.func @transform_2(%arg0: i32) -> (i32, i32) {
    %c0_i32 = arith.constant 0 : i32
    %c0_i32_0 = arith.constant 0 : i32
    return %arg0, %c0_i32 : i32, i32
  }
  func.func @transform_3(%arg0: i32) -> (i32, i32) {
    %c0_i32 = arith.constant 0 : i32
    %c0_i32_0 = arith.constant 0 : i32
    return %arg0, %c0_i32 : i32, i32
  }
}

</mosaic_0001>

<bundles_post_ra>
// kernel: tpu_custom_call.1
= control target key start
LH: loop header
LB: loop body
LE: loop exit
PB: predicated region body
PF: predicated region fallthrough
CT: control target
= control target key end

     0   :  { %10 = vsyncpa [#allocation5], 0  ;;  %s144_s0 = inlined_call_operand.<no memory space> [shape: f32[1], index: 0, kind: input, shape index: {}]   ;;  %s145_s1 = inlined_call_operand.<no memory space> [shape: f32[1], index: 1, kind: input, shape index: {}]   ;;  %s146_s2 = inlined_call_operand.hbm [shape: f32[8,128], index: 2, kind: input, shape index: {}]   ;;  %s147_s3 = inlined_call_operand.hbm [shape: f32[8,128], index: 3, kind: output, shape index: {}]  }
   0x1   :  { %11 = vsyncpa [#allocation6], 0  ;;  %s21_s14 = sshll.u32 %s146_s2, 4  ;;  %s110_s15 = smov [#allocation4]   ;;  %s22_s14 = int_to_ptr.hbm [resolvable:$true] %s21_s14 }
   0x2   :  { %s23_s16 = sshll.u32 %s110_s15, 4  ;;  %s24_s16 = int_to_ptr.vmem [resolvable:$true] %s23_s16 }
   0x3   :  { %26 = dma.hbm_to_vmem [thread:$0]  %s22_s14, 128, %s24_s16, [#allocation5]  }
   0x4   :  { %106 = dma.done.wait [#allocation5], 128  }
   0x5   :  { %107 = vsyncadd [#allocation5], 4294967168  ;;  %v34_v0 = vstv %s144_s0  ;;  %v33_v1 = vld [vmem:[#allocation4] sm:$0xff]  ;;  %v36_v2 = vstv %s145_s1  ;;  %s111_s21 = smov [#allocation7]   ;;  %s46_s24 = sshll.u32 %s147_s3, 4  ;;  %s47_s24 = int_to_ptr.hbm [resolvable:$true] %s46_s24 }
   0x6   :  { %s44_s22 = sshll.u32 %s111_s21, 4  ;;  %v35_v3 = vmul.f32 %v34_v0, %v33_v1  ;;  %s45_s22 = int_to_ptr.vmem [resolvable:$true] %s44_s22 }
   0x8   :  { %v37_v4 = vadd.f32 %v36_v2, %v35_v3 }
   0xa   :  { %38 = vst [vmem:[#allocation7] sm:$0xff] %v37_v4 }
   0xb   :  { %49 = dma.vmem_to_hbm [thread:$0]  %s45_s22, 128, %s47_s24, [#allocation6]  }
   0xc   :  { %108 = dma.done.wait [#allocation6], 128  }
   0xd   :  { %109 = vsyncadd [#allocation6], 4294967168 }
   0xe   :  { %54 = vsyncpa [#allocation5], 1 }
   0xf   :  { %55 = vsyncpa [#allocation6], 1 }

</bundles_post_ra>
